<compile_context>
chip_gen: v7x
topology: tpu7x:2x2x1
jax: 0.10.0
libtpu: 0.0.40
codegen_flags: <defaults>
</compile_context>

<pallas_src>
import numpy as np

import jax
import jax.numpy as jnp
from jax.experimental import pallas as pl
from jax.experimental.pallas import tpu as pltpu


def _decode_kernel(pred_ref, mul_s_ref, mul_e_ref, add_ref, out_ref):
    """Decodes a (bt, C, HW) slab of raw YOLO head outputs.

    pred_ref : (bt, C, HW) f32 — raw head outputs (C = A * (5 + num_classes)).
    mul_s_ref: (C, HW)  f32 — sigmoid-branch scale (stride / 1 / 0), resident.
    mul_e_ref: (C, HW)  f32 — exp-branch scale (anchor*stride on w/h rows, else 0).
    add_ref  : (C, HW)  f32 — additive term (grid*stride on x/y rows, else 0).
    out_ref  : (bt, C, HW) f32.
    """
    p = pred_ref[...]
    mul_s = mul_s_ref[...]
    mul_e = mul_e_ref[...]

    s = jax.nn.sigmoid(p)                                    # EUP
    # exp() is only consumed where mul_e != 0 (the w/h rows); zero the argument
    # elsewhere so a large raw logit can never become inf * 0 = nan.
    e = jnp.exp(jnp.where(mul_e != 0.0, p, 0.0))             # EUP

    # x,y      : sigmoid*stride + grid*stride   (mul_s = stride, add = grid*stride)
    # w,h      : exp * anchor * stride          (mul_e = anchor*stride)
    # conf/cls : sigmoid                        (mul_s = 1)
    out_ref[...] = s * mul_s + e * mul_e + add_ref[...]      # one coalesced store


def decode_box(inp, anchors, num_classes, img_size):
    """Pallas implementation of DecodeBox.forward.

    inp: (B, A*(5+num_classes), H, W) float32, NCHW like PyTorch.
    Returns (B, A*H*W, 5+num_classes) float32.
    """
    B, C, H, W = inp.shape
    A = len(anchors)
    attrs = 5 + num_classes
    assert C == A * attrs, "channel dim must equal num_anchors * (5 + num_classes)"
    HW = H * W

    stride_h = float(img_size[1]) / H
    stride_w = float(img_size[0]) / W

    # ---- host-side precompute of the grid-resident affine planes ----
    gx = (np.arange(HW) % W).astype(np.float32)
    gy = (np.arange(HW) // W).astype(np.float32)

    mul_s = np.zeros((A, attrs, HW), np.float32)
    mul_e = np.zeros((A, attrs, HW), np.float32)
    add = np.zeros((A, attrs, HW), np.float32)

    mul_s[:, 0, :] = stride_w
    mul_s[:, 1, :] = stride_h
    mul_s[:, 4:, :] = 1.0
    for a, (aw, ah) in enumerate(anchors):
        mul_e[a, 2, :] = (aw / stride_w) * stride_w
        mul_e[a, 3, :] = (ah / stride_h) * stride_h
    add[:, 0, :] = gx * stride_w
    add[:, 1, :] = gy * stride_h

    mul_s = jnp.asarray(mul_s.reshape(C, HW))
    mul_e = jnp.asarray(mul_e.reshape(C, HW))
    add = jnp.asarray(add.reshape(C, HW))

    pred = inp.astype(jnp.float32).reshape(B, C, HW)   # pure view of NCHW

    # Padded VMEM footprint of one (C, HW) slab under (8,128) tiling.
    c_pad = -(-C // 8) * 8
    hw_pad = -(-HW // 128) * 128
    slab_bytes = c_pad * hw_pad * 4

    # Fold batches per grid step: largest divisor of B whose block stays under
    # ~2 MiB, but keep >= 2 grid steps when B > 1 (megacore sharding).
    target = 2 << 20
    bt = 1
    for d in range(1, B + 1):
        if B % d != 0:
            continue
        if d * slab_bytes > max(target, slab_bytes):
            continue
        if B > 1 and B // d < 2:
            continue
        bt = d
    grid = (B // bt,)

    # pred + out double-buffered, three resident planes, headroom.
    vmem_need = 4 * bt * slab_bytes + 3 * slab_bytes + (2 << 20)
    vmem_limit = int(min(max(vmem_need, 16 << 20), 64 << 20))

    n_elem = B * C * HW
    cost = pl.CostEstimate(
        flops=6 * n_elem,
        transcendentals=2 * n_elem,
        bytes_accessed=(2 * n_elem + 3 * C * HW) * 4,
    )

    out = pl.pallas_call(
        _decode_kernel,
        out_shape=jax.ShapeDtypeStruct((B, C, HW), jnp.float32),
        grid=grid,
        in_specs=[
            pl.BlockSpec((bt, C, HW), lambda b: (b, 0, 0)),   # pred (streamed)
            pl.BlockSpec((C, HW), lambda b: (0, 0)),          # mul_s (resident)
            pl.BlockSpec((C, HW), lambda b: (0, 0)),          # mul_e (resident)
            pl.BlockSpec((C, HW), lambda b: (0, 0)),          # add   (resident)
        ],
        out_specs=pl.BlockSpec((bt, C, HW), lambda b: (b, 0, 0)),
        compiler_params=pltpu.CompilerParams(
            dimension_semantics=("parallel",),
            vmem_limit_bytes=vmem_limit,
        ),
        cost_estimate=cost,
    )(pred, mul_s, mul_e, add)

    # Match PyTorch output layout exactly:
    # (B, C, HW) -> (B, A, attrs, HW) -> (B, A, HW, attrs) -> (B, A*HW, attrs)
    # TODO(synk): downstream consumers (thresholding / NMS) could consume the
    # channel-major (B, C, HW) layout directly and skip this extra HBM pass.
    out = out.reshape(B, A, attrs, HW)
    out = jnp.transpose(out, (0, 1, 3, 2)).reshape(B, A * HW, attrs)
    return out


def decode_box_reference(inp, anchors, num_classes, img_size):
    """Pure-JAX reference mirroring the PyTorch module exactly."""
    B, C, H, W = inp.shape
    A = len(anchors)
    attrs = 5 + num_classes
    stride_h = float(img_size[1]) / H
    stride_w = float(img_size[0]) / W
    scaled = np.array([[aw / stride_w, ah / stride_h] for (aw, ah) in anchors],
                      dtype=np.float32)

    pred = inp.reshape(B, A, attrs, H, W).transpose(0, 1, 3, 4, 2)  # (B,A,H,W,attrs)
    x = jax.nn.sigmoid(pred[..., 0])
    y = jax.nn.sigmoid(pred[..., 1])
    w = pred[..., 2]
    h = pred[..., 3]
    conf = jax.nn.sigmoid(pred[..., 4])
    pred_cls = jax.nn.sigmoid(pred[..., 5:])

    grid_x = jnp.broadcast_to(jnp.arange(W, dtype=jnp.float32), (B, A, H, W))
    grid_y = jnp.broadcast_to(jnp.arange(H, dtype=jnp.float32)[:, None], (B, A, H, W))
    anchor_w = jnp.broadcast_to(jnp.asarray(scaled[:, 0])[None, :, None, None],
                                (B, A, H, W))
    anchor_h = jnp.broadcast_to(jnp.asarray(scaled[:, 1])[None, :, None, None],
                                (B, A, H, W))

    boxes = jnp.stack(
        [x + grid_x, y + grid_y, jnp.exp(w) * anchor_w, jnp.exp(h) * anchor_h], axis=-1)
    scale = jnp.array([stride_w, stride_h, stride_w, stride_h], dtype=jnp.float32)
    out = jnp.concatenate(
        [boxes.reshape(B, -1, 4) * scale,
         conf.reshape(B, -1, 1),
         pred_cls.reshape(B, -1, num_classes)], axis=-1)
    return out


if __name__ == "__main__":
    # --- main check: small, deterministic configuration ---
    anchors = [(10.0, 13.0), (16.0, 30.0), (33.0, 23.0)]
    num_classes = 4
    img_size = (64, 64)            # (img_w, img_h)
    B, H, W = 2, 16, 16
    A = len(anchors)
    attrs = 5 + num_classes        # 9
    C = A * attrs                  # 27

    key = jax.random.PRNGKey(0)
    x = jax.random.normal(key, (B, C, H, W), dtype=jnp.float32)

    out = decode_box(x, anchors, num_classes, img_size)
    out = jax.block_until_ready(out)

    ref = jax.block_until_ready(decode_box_reference(x, anchors, num_classes, img_size))
    assert out.shape == (B, A * H * W, attrs), out.shape
    np.testing.assert_allclose(np.asarray(out), np.asarray(ref), rtol=1e-5, atol=1e-5)

    # --- secondary check: real YOLO-like grid where H*W is NOT a multiple of
    # 128 (13x13 = 169) to exercise the lane-padded tail path ---
    anchors2 = [(116.0, 90.0), (156.0, 198.0), (373.0, 326.0)]
    nc2 = 2
    img2 = (416, 416)
    B2, H2, W2 = 1, 13, 13
    C2 = len(anchors2) * (5 + nc2)
    x2 = jax.random.normal(jax.random.PRNGKey(1), (B2, C2, H2, W2), dtype=jnp.float32)
    out2 = jax.block_until_ready(decode_box(x2, anchors2, nc2, img2))
    ref2 = jax.block_until_ready(decode_box_reference(x2, anchors2, nc2, img2))
    np.testing.assert_allclose(np.asarray(out2), np.asarray(ref2), rtol=1e-5, atol=1e-4)

    print("KERNEL_OK")
</pallas_src>

<mosaic_0001>
module attributes {stable_mosaic.version = 11 : i64} {
  func.func @_decode_kernel(%arg0: i32, %arg1: memref<1x27x256xf32, #tpu.memory_space<vmem>>, %arg2: memref<27x256xf32, #tpu.memory_space<vmem>>, %arg3: memref<27x256xf32, #tpu.memory_space<vmem>>, %arg4: memref<27x256xf32, #tpu.memory_space<vmem>>, %arg5: memref<1x27x256xf32, #tpu.memory_space<vmem>>) attributes {dimension_semantics = [#tpu.dimension_semantics<parallel>], iteration_bounds = array<i64: 2>, scalar_prefetch = 0 : i64, scratch_operands = 0 : i64, tpu.core_type = #tpu.core_type<tc>, window_params = [{transform_indices = @transform_0, window_bounds = array<i64: 1, 27, 256>}, {pipeline_mode = #tpu.pipeline_mode<synchronous>, transform_indices = @transform_1, window_bounds = array<i64: 27, 256>}, {pipeline_mode = #tpu.pipeline_mode<synchronous>, transform_indices = @transform_2, window_bounds = array<i64: 27, 256>}, {pipeline_mode = #tpu.pipeline_mode<synchronous>, transform_indices = @transform_3, window_bounds = array<i64: 27, 256>}, {transform_indices = @transform_4, window_bounds = array<i64: 1, 27, 256>}]} {
    %c0 = arith.constant 0 : index
    %c0_0 = arith.constant 0 : index
    %c0_1 = arith.constant 0 : index
    %0 = vector.load %arg1[%c0, %c0_0, %c0_1] : memref<1x27x256xf32, #tpu.memory_space<vmem>>, vector<1x27x256xf32>
    %c0_2 = arith.constant 0 : index
    %c0_3 = arith.constant 0 : index
    %1 = vector.load %arg2[%c0_2, %c0_3] : memref<27x256xf32, #tpu.memory_space<vmem>>, vector<27x256xf32>
    %c0_4 = arith.constant 0 : index
    %c0_5 = arith.constant 0 : index
    %2 = vector.load %arg3[%c0_4, %c0_5] : memref<27x256xf32, #tpu.memory_space<vmem>>, vector<27x256xf32>
    %3 = arith.negf %0 : vector<1x27x256xf32>
    %4 = math.exp %3 : vector<1x27x256xf32>
    %cst = arith.constant 1.000000e+00 : f32
    %5 = vector.broadcast %cst : f32 to vector<1x27x256xf32>
    %6 = arith.addf %5, %4 : vector<1x27x256xf32>
    %7 = arith.divf %5, %6 : vector<1x27x256xf32>
    %cst_6 = arith.constant 0.000000e+00 : f32
    %8 = vector.broadcast %cst_6 : f32 to vector<27x256xf32>
    %9 = arith.cmpf one, %2, %8 : vector<27x256xf32>
    %cst_7 = arith.constant 0.000000e+00 : f32
    %10 = vector.shape_cast %9 : vector<27x256xi1> to vector<1x27x256xi1>
    %11 = vector.broadcast %cst_7 : f32 to vector<1x27x256xf32>
    %12 = arith.select %10, %0, %11 : vector<1x27x256xi1>, vector<1x27x256xf32>
    %13 = math.exp %12 : vector<1x27x256xf32>
    %14 = vector.shape_cast %1 : vector<27x256xf32> to vector<1x27x256xf32>
    %15 = arith.mulf %7, %14 : vector<1x27x256xf32>
    %16 = vector.shape_cast %2 : vector<27x256xf32> to vector<1x27x256xf32>
    %17 = arith.mulf %13, %16 : vector<1x27x256xf32>
    %18 = arith.addf %15, %17 : vector<1x27x256xf32>
    %c0_8 = arith.constant 0 : index
    %c0_9 = arith.constant 0 : index
    %19 = vector.load %arg4[%c0_8, %c0_9] : memref<27x256xf32, #tpu.memory_space<vmem>>, vector<27x256xf32>
    %20 = vector.shape_cast %19 : vector<27x256xf32> to vector<1x27x256xf32>
    %21 = arith.addf %18, %20 : vector<1x27x256xf32>
    %c0_10 = arith.constant 0 : index
    %c0_11 = arith.constant 0 : index
    %c0_12 = arith.constant 0 : index
    %22 = vector.load %arg5[%c0_10, %c0_11, %c0_12] : memref<1x27x256xf32, #tpu.memory_space<vmem>>, vector<1x27x256xf32>
    tpu.vector_store %arg5[%c0_10, %c0_11, %c0_12], %21 {strides = array<i32>} : memref<1x27x256xf32, #tpu.memory_space<vmem>>, vector<1x27x256xf32>,
    return
  }
  func.func @transform_0(%arg0: i32) -> (i32, i32, i32) {
    %c0_i32 = arith.constant 0 : i32
    %c0_i32_0 = arith.constant 0 : i32
    %c0_i32_1 = arith.constant 0 : i32
    return %arg0, %c0_i32, %c0_i32_0 : i32, i32, i32
  }
  func.func @transform_1(%arg0: i32) -> (i32, i32) {
    %c0_i32 = arith.constant 0 : i32
    %c0_i32_0 = arith.constant 0 : i32
    %c0_i32_1 = arith.constant 0 : i32
    return %c0_i32, %c0_i32_0 : i32, i32
  }
  func.func @transform_2(%arg0: i32) -> (i32, i32) {
    %c0_i32 = arith.constant 0 : i32
    %c0_i32_0 = arith.constant 0 : i32
    %c0_i32_1 = arith.constant 0 : i32
    return %c0_i32, %c0_i32_0 : i32, i32
  }
  func.func @transform_3(%arg0: i32) -> (i32, i32) {
    %c0_i32 = arith.constant 0 : i32
    %c0_i32_0 = arith.constant 0 : i32
    %c0_i32_1 = arith.constant 0 : i32
    return %c0_i32, %c0_i32_0 : i32, i32
  }
  func.func @transform_4(%arg0: i32) -> (i32, i32, i32) {
    %c0_i32 = arith.constant 0 : i32
    %c0_i32_0 = arith.constant 0 : i32
    %c0_i32_1 = arith.constant 0 : i32
    return %arg0, %c0_i32, %c0_i32_0 : i32, i32, i32
  }
}

</mosaic_0001>

<bundles_post_ra>
// kernel: tpu_custom_call.1
= control target key start
LH: loop header
LB: loop body
LE: loop exit
PB: predicated region body
PF: predicated region fallthrough
CT: control target
= control target key end

     0   :  { %s515_s15 = smov 0   ;;  %s663_s0 = inlined_call_operand.vmem [shape: f32[2,27,256], index: 0, kind: input, shape index: {}]   ;;  %s664_s1 = inlined_call_operand.vmem [shape: f32[27,256], index: 1, kind: input, shape index: {}]   ;;  %s665_s2 = inlined_call_operand.vmem [shape: f32[27,256], index: 2, kind: input, shape index: {}]   ;;  %s666_s3 = inlined_call_operand.vmem [shape: f32[27,256], index: 3, kind: input, shape index: {}]   ;;  %s667_s4 = inlined_call_operand.vmem [shape: f32[2,27,256], index: 4, kind: output, shape index: {}]  }
   0x1 LB: > { %s405_s16 = sadd.s32 4294967295, %s488_s15   ;;  %p409_p0 = scmp.ge.s32.totalorder %s488_s15, 1  ;;  %s488_s15 = sphi %s515_s15, %s14_s15  }
   0x2   : > { %p162_p1 = scmp.lt.s32.totalorder %s488_s15, 3 }
   0x4   : > { %p163_p2 = pnand %p409_p0, %p162_p1 }
   0x5   : > { %p188_p3 = scmp.lt.s32.totalorder (!%p163_p2), %s405_s16, 1  ;;  %v526_v0 = vld [vmem:[%s665_s2] sm:$0xff] (!%p163_p2)  ;;  %v533_v1 = vld [vmem:[%s665_s2 + $0x8] sm:$0xff] (!%p163_p2)  ;;  %v547_v2 = vld [vmem:[%s665_s2 + $0x10] sm:$0xff] (!%p163_p2) }
   0x6   : > { %166 = sbr.rel (%p163_p2) target bundleno = 66 (0x42), region = 36  ;;  %vm270_vm0 = vcmp.ne.f32.partialorder (!%p163_p2), %v526_v0, 0.0  ;;  %vm271_vm1 = vcmp.ne.f32.partialorder (!%p163_p2), %v533_v1, 0.0  ;;  %v556_v9 = vld [vmem:[%s665_s2 + $0x18] sm:$0xff] (!%p163_p2)  ;;  %vm272_vm2 = vcmp.ne.f32.partialorder (!%p163_p2), %v547_v2, 0.0  ;;  %v565_v15 = vld [vmem:[%s665_s2 + $0x20] sm:$0xff] (!%p163_p2) }
   0x7   : > { %vm273_vm3 = vcmp.ne.f32.partialorder (!%p163_p2), %v556_v9, 0.0  ;;  %vm274_vm4 = vcmp.ne.f32.partialorder (!%p163_p2), %v565_v15, 0.0  ;;  %v572_v23 = vld [vmem:[%s665_s2 + $0x28] sm:$0xff] (!%p163_p2)  ;;  %v578_v28 = vld [vmem:[%s665_s2 + $0x30] sm:$0x7] (!%p163_p2)  ;;  %v206_v55 = vld [vmem:[%s664_s1] sm:$0xff] (!%p163_p2) }
   0x8   : > { %vm275_vm5 = vcmp.ne.f32.partialorder (!%p163_p2), %v572_v23, 0.0  ;;  %vm276_vm6 = vcmp.ne.f32.partialorder (!%p163_p2), %v578_v28, 0.0  ;;  %v586_v35 = vld [vmem:[%s665_s2 + $0x38] sm:$0x7] (!%p163_p2)  ;;  %v207_v60 = vld [vmem:[%s664_s1 + $0x8] sm:$0xff] (!%p163_p2) }
   0x9   : > { %vm277_vm7 = vcmp.ne.f32.partialorder (!%p163_p2), %v586_v35, 0.0 }
   0xd   : > { %s669_s16 = smov (!%p188_p3, %s405_s16), 1 }
   0xe   : > { %s424_s21 = sshll.u32 %s669_s16, 6 }
   0xf   : > { %s542_s24 = scalar_lea.vmem %s663_s0, %s424_s21 }
  0x10   : > { %v198_v3 = vld [vmem:[%s542_s24] sm:$0xff]  ;;  %v199_v4 = vld [vmem:[%s542_s24 + $0x8] sm:$0xff]  ;;  %v200_v5 = vld [vmem:[%s542_s24 + $0x10] sm:$0xff] }
  0x11   : > { %v414_v6 = vmul.f32 -1.442695, %v198_v3  ;;  %v278_v7 = vsel %vm270_vm0, %v198_v3, 0.0  ;;  %v415_v8 = vmul.f32 -1.442695, %v199_v4  ;;  %v279_v10 = vsel %vm271_vm1, %v199_v4, 0.0 }
  0x12   : > { %v416_v11 = vmul.f32 -1.442695, %v200_v5  ;;  %v201_v12 = vld [vmem:[%s542_s24 + $0x18] sm:$0xff]  ;;  %v286_v13 = vmul.f32 1.442695, %v278_v7  ;;  %v202_v14 = vld [vmem:[%s542_s24 + $0x20] sm:$0xff] }
  0x13   : > { %434 = vpow2.f32 %v414_v6  ;;  %v280_v16 = vsel %vm272_vm2, %v200_v5, 0.0  ;;  %v417_v17 = vmul.f32 -1.442695, %v201_v12  ;;  %v288_v18 = vmul.f32 1.442695, %v279_v10  ;;  %v203_v19 = vld [vmem:[%s542_s24 + $0x28] sm:$0xff] }
  0x14   : > { %436 = vpow2.f32 %v415_v8  ;;  %v281_v20 = vsel %vm273_vm3, %v201_v12, 0.0  ;;  %v418_v21 = vmul.f32 -1.442695, %v202_v14  ;;  %v290_v22 = vmul.f32 1.442695, %v280_v16  ;;  %v326_v5 = vld [vmem:[%s666_s3] sm:$0xff] }
  0x15   : > { %438 = vpow2.f32 %v416_v11  ;;  %v204_v24 = vld [vmem:[%s542_s24 + $0x30] sm:$0x7]  ;;  %v419_v25 = vmul.f32 -1.442695, %v203_v19  ;;  %v292_v26 = vmul.f32 1.442695, %v281_v20 }
  0x16   : > { %440 = vpow2.f32 %v286_v13  ;;  %v282_v27 = vsel %vm274_vm4, %v202_v14, 0.0  ;;  %v420_v29 = vmul.f32 -1.442695, %v204_v24  ;;  %v205_v30 = vld [vmem:[%s542_s24 + $0x38] sm:$0x7]  ;;  %v283_v34 = vsel %vm275_vm5, %v203_v19, 0.0  ;;  %s609_s24 = scalar_lea.vmem %s667_s4, %s424_s21 }
  0x17   : > { %442 = vpow2.f32 %v417_v17  ;;  %v294_v32 = vmul.f32 1.442695, %v282_v27  ;;  %v421_v37 = vmul.f32 -1.442695, %v205_v30  ;;  %v284_v39 = vsel %vm276_vm6, %v204_v24, 0.0  ;;  %v209_v12 = vld [vmem:[%s664_s1 + $0x18] sm:$0xff] }
  0x18   : > { %444 = vpow2.f32 %v288_v18  ;;  %v296_v41 = vmul.f32 1.442695, %v283_v34  ;;  %v298_v45 = vmul.f32 1.442695, %v284_v39  ;;  %v285_v48 = vsel %vm277_vm7, %v205_v30, 0.0  ;;  %v328_v20 = vld [vmem:[%s666_s3 + $0x10] sm:$0xff] }
  0x19   : > { %446 = vpow2.f32 %v418_v21  ;;  %v300_v53 = vmul.f32 1.442695, %v285_v48  ;;  %v210_v21 = vld [vmem:[%s664_s1 + $0x20] sm:$0xff]  ;;  %v211_v30 = vld [vmem:[%s664_s1 + $0x28] sm:$0xff]  ;;  %v213_v48 = vld [vmem:[%s664_s1 + $0x38] sm:$0x7] }
  0x1a   : > { %448 = vpow2.f32 %v290_v22 }
  0x1b   : > { %450 = vpow2.f32 %v419_v25 }
  0x1c   : > { %452 = vpow2.f32 %v292_v26 }
  0x1d   : > { %v435_v31 = vpop.eup %434  ;;  %454 = vpow2.f32 %v420_v29 }
  0x1e   : > { %v246_v33 = vadd.f32 1.0, %v435_v31  ;;  %v437_v36 = vpop.eup %436 }
  0x1f   : > { %v247_v38 = vadd.f32 1.0, %v437_v36  ;;  %v439_v40 = vpop.eup %438 }
  0x20   : > { %456 = vrcp.f32 %v246_v33  ;;  %v441_v42 = vpop.eup %440  ;;  %v248_v43 = vadd.f32 1.0, %v439_v40 }
  0x21   : > { %458 = vpow2.f32 %v294_v32  ;;  %v443_v44 = vpop.eup %442  ;;  %v310_v58 = vmul.f32 %v441_v42, %v526_v0  ;;  %v208_v0 = vld [vmem:[%s664_s1 + $0x10] sm:$0xff] }
  0x22   : > { %460 = vrcp.f32 %v247_v38  ;;  %v445_v46 = vpop.eup %444  ;;  %v249_v47 = vadd.f32 1.0, %v443_v44 }
  0x23   : > { %462 = vpow2.f32 %v421_v37  ;;  %v447_v49 = vpop.eup %446  ;;  %v311_v3 = vmul.f32 %v445_v46, %v533_v1  ;;  %v327_v1 = vld [vmem:[%s666_s3 + $0x8] sm:$0xff]  ;;  %v212_v37 = vld [vmem:[%s664_s1 + $0x30] sm:$0x7] }
  0x24   : > { %464 = vrcp.f32 %v248_v43  ;;  %v449_v50 = vpop.eup %448  ;;  %v250_v51 = vadd.f32 1.0, %v447_v49 }
  0x25   : > { %466 = vpow2.f32 %v296_v41  ;;  %v451_v52 = vpop.eup %450  ;;  %v312_v10 = vmul.f32 %v449_v50, %v547_v2 }
  0x26   : > { %468 = vrcp.f32 %v249_v47  ;;  %v453_v54 = vpop.eup %452  ;;  %v251_v56 = vadd.f32 1.0, %v451_v52  ;;  %v332_v47 = vld [vmem:[%s666_s3 + $0x30] sm:$0x7] }
  0x27   : > { %470 = vpow2.f32 %v298_v45  ;;  %v455_v57 = vpop.eup %454  ;;  %v313_v18 = vmul.f32 %v453_v54, %v556_v9  ;;  %v329_v9 = vld [vmem:[%s666_s3 + $0x18] sm:$0xff] }
  0x28   : > { %472 = vrcp.f32 %v250_v51  ;;  %v252_v61 = vadd.f32 1.0, %v455_v57  ;;  %v333_v54 = vld [vmem:[%s666_s3 + $0x38] sm:$0x7] }
  0x29   : > { %474 = vrcp.f32 %v251_v56 }
  0x2a   : > { %v457_v59 = vpop.eup %456  ;;  %476 = vpow2.f32 %v300_v53 }
  0x2b   : > { %v459_v62 = vpop.eup %458  ;;  %v302_v63 = vmul.f32 %v457_v59, %v206_v55  ;;  %478 = vrcp.f32 %v252_v61 }
  0x2c   : > { %v461_v4 = vpop.eup %460  ;;  %v314_v27 = vmul.f32 %v459_v62, %v565_v15  ;;  %v330_v15 = vld [vmem:[%s666_s3 + $0x20] sm:$0xff] }
  0x2d   : > { %v463_v6 = vpop.eup %462  ;;  %v318_v7 = vadd.f32 %v310_v58, %v302_v63  ;;  %v303_v8 = vmul.f32 %v461_v4, %v207_v60 }
  0x2e   : > { %v465_v11 = vpop.eup %464  ;;  %v253_v13 = vadd.f32 1.0, %v463_v6 }
  0x2f   : > { %v467_v14 = vpop.eup %466  ;;  %v334_v16 = vadd.f32 %v326_v5, %v318_v7  ;;  %v319_v2 = vadd.f32 %v311_v3, %v303_v8  ;;  %v304_v17 = vmul.f32 %v465_v11, %v208_v0 }
  0x30   : > { %v469_v19 = vpop.eup %468  ;;  %480 = vrcp.f32 %v253_v13  ;;  %v315_v34 = vmul.f32 %v467_v14, %v572_v23  ;;  %v331_v23 = vld [vmem:[%s666_s3 + $0x28] sm:$0xff] }
  0x31   : > { %v471_v22 = vpop.eup %470  ;;  %342 = vst [vmem:[%s609_s24] sm:$0xff] %v334_v16  ;;  %v335_v24 = vadd.f32 %v327_v1, %v319_v2  ;;  %v320_v25 = vadd.f32 %v312_v10, %v304_v17  ;;  %v305_v26 = vmul.f32 %v469_v19, %v209_v12 }
  0x32   : > { %v473_v29 = vpop.eup %472  ;;  %v316_v42 = vmul.f32 %v471_v22, %v578_v28 }
  0x33   : > { %343 = vst [vmem:[%s609_s24 + $0x8] sm:$0xff] %v335_v24  ;;  %v336_v31 = vadd.f32 %v328_v20, %v320_v25  ;;  %v321_v32 = vadd.f32 %v313_v18, %v305_v26  ;;  %v306_v33 = vmul.f32 %v473_v29, %v210_v21  ;;  %v475_v36 = vpop.eup %474 }
  0x34   : > { %v477_v38 = vpop.eup %476  ;;  %v307_v41 = vmul.f32 %v475_v36, %v211_v30 }
  0x35   : > { %344 = vst [vmem:[%s609_s24 + $0x10] sm:$0xff] %v336_v31  ;;  %v337_v39 = vadd.f32 %v329_v9, %v321_v32  ;;  %v322_v40 = vadd.f32 %v314_v27, %v306_v33  ;;  %v479_v43 = vpop.eup %478  ;;  %v317_v50 = vmul.f32 %v477_v38, %v586_v35 }
  0x36   : > { %v323_v45 = vadd.f32 %v315_v34, %v307_v41  ;;  %v308_v46 = vmul.f32 %v479_v43, %v212_v37 }
  0x37   : > { %345 = vst [vmem:[%s609_s24 + $0x18] sm:$0xff] %v337_v39  ;;  %v338_v44 = vadd.f32 %v330_v15, %v322_v40 }
  0x38   : > { %v339_v28 = vadd.f32 %v331_v23, %v323_v45  ;;  %v324_v49 = vadd.f32 %v316_v42, %v308_v46 }
  0x39   : > { %346 = vst [vmem:[%s609_s24 + $0x20] sm:$0xff] %v338_v44 }
  0x3a   : > { %v481_v51 = vpop.eup %480  ;;  %347 = vst [vmem:[%s609_s24 + $0x28] sm:$0xff] %v339_v28  ;;  %v340_v52 = vadd.f32 %v332_v47, %v324_v49 }
  0x3b   : > { %v309_v53 = vmul.f32 %v481_v51, %v213_v48 }
  0x3c   : > { %348 = vst [vmem:[%s609_s24 + $0x30] sm:$0x7] %v340_v52 }
  0x3d   : > { %v325_v55 = vadd.f32 %v317_v50, %v309_v53 }
  0x3f   : > { %v341_v56 = vadd.f32 %v333_v54, %v325_v55 }
  0x41   : > { %349 = vst [vmem:[%s609_s24 + $0x38] sm:$0x7] %v341_v56 }
  0x42 PF: > { %s14_s15 = sadd.s32 1, %s488_s15  }
  0x43   : > { %p11_p4 = scmp.ge.s32.totalorder %s14_s15, 4  }
  0x45   :  { %13 = sbr.rel (!%p11_p4) target bundleno = 1 (0x1), region = 66 }

</bundles_post_ra>
